<compile_context>
chip_gen: v5e
topology: v5e:2x2
jax: 0.10.0
libtpu: 0.0.40
codegen_flags: <defaults>
</compile_context>

<pallas_src>
import math

import jax
import jax.numpy as jnp
from jax.experimental import pallas as pl
from jax.experimental.pallas import tpu as pltpu


def _sum_log_kernel(x_ref, o_ref, acc_ref):
    """Accumulate sum(log(x)) over the streamed row tiles into an (8, C) scratch."""
    t_idx = pl.program_id(1)

    @pl.when(t_idx == 0)
    def _():
        acc_ref[...] = jnp.zeros_like(acc_ref)

    x = x_ref[...].astype(jnp.float32)          # (tile_n, C) probabilities
    log_x = jnp.log(x)                          # one EUP transcendental per element
    tn, C = log_x.shape
    # Partial-sum into an (8, C) slab: pure vreg-wise VALU adds, no cross-lane work,
    # and only an 8-row VMEM read-modify-write per grid step (not a full-tile one).
    acc_ref[...] += log_x.reshape(tn // 8, 8, C).sum(axis=0)

    @pl.when(t_idx == pl.num_programs(1) - 1)
    def _():
        # Single epilogue cross-lane reduce of this core's (8, C) partials.
        o_ref[...] = jnp.broadcast_to(jnp.sum(acc_ref[...]), o_ref.shape)


def _vmem_capacity_bytes():
    try:
        return int(pltpu.get_tpu_info().vmem_capacity_bytes)
    except Exception:
        return 64 << 20          # conservative floor (v7x per-TC VMEM)


def _pick_tile_rows(rows, unit, budget_rows, cap_rows):
    """Largest divisor of `rows` (multiple of `unit`) under the byte budget, avoiding
    a collapse to a tiny tile when a modestly larger divisor still fits VMEM."""
    divisors = [d for d in range(unit, rows + 1, unit) if rows % d == 0]
    under = [d for d in divisors if d <= budget_rows]
    best = max(under) if under else unit
    if best < min(budget_rows, 64):
        over = [d for d in divisors if budget_rows < d <= cap_rows]
        if over:
            best = min(over)
    return best


def _sum_log_pallas(x, *, max_block_bytes=None):
    """Returns scalar f32 sum_{i,c} log(x[i,c]) via a streaming Pallas reduction."""
    N, C = x.shape
    itemsize = jnp.dtype(x.dtype).itemsize
    unit = {4: 8, 2: 16, 1: 32}.get(itemsize, 8)     # sublane-packing-aware row unit
    assert N % unit == 0, f"N must be a multiple of {unit} for dtype {x.dtype}"

    vmem_cap = _vmem_capacity_bytes()
    if max_block_bytes is None:
        # ~16 MiB x blocks on 128 MiB chips (v5e/v6e), ~8 MiB on v7x (64 MiB).
        max_block_bytes = min(16 << 20, vmem_cap // 8)

    # Leading "parallel" axis: split rows in two so v7x's 2 TensorCores each take half
    # (sequential and harmless on 1-TC chips).
    n_units = N // unit
    S = 2 if (n_units >= 2 and n_units % 2 == 0) else 1
    rows_per_split = N // S

    budget_rows = max(unit, (max_block_bytes // (itemsize * C)) // unit * unit)
    cap_rows = max(unit, (int(0.35 * vmem_cap) // (itemsize * C)) // unit * unit)
    tile_n = _pick_tile_rows(rows_per_split, unit, budget_rows,
                             min(cap_rows, rows_per_split))
    T = rows_per_split // tile_n

    # Scoped-VMEM budget: double-buffered x blocks + (8, C) accumulator + margin.
    x_block_bytes = tile_n * C * itemsize
    acc_bytes = 8 * C * 4
    vmem_bytes = max(2 * x_block_bytes + acc_bytes + (4 << 20), 16 << 20)
    vmem_bytes = min(vmem_bytes, int(0.9 * vmem_cap))

    out = pl.pallas_call(
        _sum_log_kernel,
        out_shape=jax.ShapeDtypeStruct((S, 1, 1), jnp.float32),
        grid_spec=pltpu.PrefetchScalarGridSpec(
            num_scalar_prefetch=0,
            grid=(S, T),
            in_specs=[pl.BlockSpec((tile_n, C), lambda s, t: (s * T + t, 0))],
            out_specs=pl.BlockSpec((1, 1, 1), lambda s, t: (s, 0, 0)),
            scratch_shapes=[pltpu.VMEM((8, C), jnp.float32)],
        ),
        compiler_params=pltpu.CompilerParams(
            dimension_semantics=("parallel", "arbitrary"),
            vmem_limit_bytes=int(vmem_bytes),
        ),
    )(x)
    return jnp.sum(out)


def label_smoothing_loss(x, target, size, smoothing=0.0, *, max_block_bytes=None):
    """x: (N, size) probabilities, target: (N,) int labels. Returns scalar f32 loss."""
    N, C = x.shape
    assert C == size

    confidence = 1.0 - smoothing
    fill = smoothing / (size - 1)
    log_conf = math.log(confidence) if confidence > 0.0 else 0.0
    log_fill = math.log(fill) if fill > 0.0 else 0.0

    # Closed-form sum of true_dist * log(true_dist): a compile-time constant.
    const = N * confidence * log_conf + N * (C - 1) * fill * log_fill

    # N-element gather of the target-class probabilities (negligible traffic).
    tgt = target.astype(jnp.int32).reshape(N, 1)
    s_tgt = jnp.sum(jnp.log(jnp.take_along_axis(x, tgt, axis=1).astype(jnp.float32)))

    if fill > 0.0 and confidence > 0.0:
        s_all = _sum_log_pallas(x, max_block_bytes=max_block_bytes)
        return const - fill * s_all - (confidence - fill) * s_tgt
    elif confidence > 0.0:          # smoothing == 0: off-target mass is zero
        return const - confidence * s_tgt
    else:                           # smoothing == 1: target mass is zero
        s_all = _sum_log_pallas(x, max_block_bytes=max_block_bytes)
        return const - fill * (s_all - s_tgt)


def _reference(x, target, size, smoothing):
    confidence = 1.0 - smoothing
    fill = smoothing / (size - 1)
    log_x = jnp.log(x.astype(jnp.float32))
    N, C = x.shape
    true_dist = jnp.full((N, C), fill, jnp.float32)
    true_dist = true_dist.at[jnp.arange(N), target].set(confidence)
    safe_t = jnp.where(true_dist > 0, true_dist, 1.0)
    term = jnp.where(true_dist > 0, true_dist * (jnp.log(safe_t) - log_x), 0.0)
    return jnp.sum(term)


if __name__ == "__main__":
    size = 128          # number of classes (module's `size`)
    N = 16              # number of samples
    smoothing = 0.1

    key = jax.random.PRNGKey(0)
    k1, k2 = jax.random.split(key)
    logits = jax.random.normal(k1, (N, size), jnp.float32)
    x = jax.nn.softmax(logits, axis=-1)                     # probabilities (module takes x.log())
    target = jax.random.randint(k2, (N,), 0, size, jnp.int32)

    loss = jax.block_until_ready(label_smoothing_loss(x, target, size, smoothing))
    ref = jax.block_until_ready(_reference(x, target, size, smoothing))
    assert jnp.allclose(loss, ref, rtol=1e-4, atol=1e-4), (loss, ref)

    print("KERNEL_OK")
</pallas_src>

<mosaic_0001>
module attributes {stable_mosaic.version = 11 : i64} {
  func.func @_sum_log_kernel(%arg0: i32, %arg1: i32, %arg2: memref<8x128xf32, #tpu.memory_space<vmem>>, %arg3: memref<1x1x1xf32, #tpu.memory_space<vmem>>, %arg4: memref<8x128xf32, #tpu.memory_space<vmem>>) attributes {dimension_semantics = [#tpu.dimension_semantics<parallel>, #tpu.dimension_semantics<arbitrary>], iteration_bounds = array<i64: 2, 1>, scalar_prefetch = 0 : i64, scratch_operands = 1 : i64, tpu.core_type = #tpu.core_type<tc>, window_params = [{transform_indices = @transform_0, window_bounds = array<i64: 8, 128>}, {transform_indices = @transform_1, window_bounds = array<i64: 1, 1, 1>}]} {
    %c0_i32 = arith.constant 0 : i32
    %0 = arith.cmpi eq, %arg1, %c0_i32 : i32
    %1 = arith.extui %0 : i1 to i32
    %c0_i32_0 = arith.constant 0 : i32
    %2 = arith.cmpi ne, %1, %c0_i32_0 : i32
    scf.if %2 {
      %cst_8 = arith.constant 0.000000e+00 : f32
      %13 = vector.broadcast %cst_8 : f32 to vector<8x128xf32>
      %c0_9 = arith.constant 0 : index
      %c0_10 = arith.constant 0 : index
      %14 = vector.load %arg4[%c0_9, %c0_10] : memref<8x128xf32, #tpu.memory_space<vmem>>, vector<8x128xf32>
      tpu.vector_store %arg4[%c0_9, %c0_10], %13 {strides = array<i32>} : memref<8x128xf32, #tpu.memory_space<vmem>>, vector<8x128xf32>,
    } else {
    }
    %c0 = arith.constant 0 : index
    %c0_1 = arith.constant 0 : index
    %3 = vector.load %arg2[%c0, %c0_1] : memref<8x128xf32, #tpu.memory_space<vmem>>, vector<8x128xf32>
    %4 = math.log %3 : vector<8x128xf32>
    %c0_2 = arith.constant 0 : index
    %c0_3 = arith.constant 0 : index
    %5 = vector.load %arg4[%c0_2, %c0_3] : memref<8x128xf32, #tpu.memory_space<vmem>>, vector<8x128xf32>
    %6 = vector.shape_cast %4 : vector<8x128xf32> to vector<1x8x128xf32>
    %cst = arith.constant dense<0.000000e+00> : vector<8x128xf32>
    %7 = vector.multi_reduction <add>, %6, %cst [0] : vector<1x8x128xf32> to vector<8x128xf32>
    %8 = arith.addf %5, %7 : vector<8x128xf32>
    %c0_4 = arith.constant 0 : index
    %c0_5 = arith.constant 0 : index
    %9 = vector.load %arg4[%c0_4, %c0_5] : memref<8x128xf32, #tpu.memory_space<vmem>>, vector<8x128xf32>
    tpu.vector_store %arg4[%c0_4, %c0_5], %8 {strides = array<i32>} : memref<8x128xf32, #tpu.memory_space<vmem>>, vector<8x128xf32>,
    %c0_i32_6 = arith.constant 0 : i32
    %10 = arith.cmpi eq, %arg1, %c0_i32_6 : i32
    %11 = arith.extui %10 : i1 to i32
    %c0_i32_7 = arith.constant 0 : i32
    %12 = arith.cmpi ne, %11, %c0_i32_7 : i32
    scf.if %12 {
      %c0_8 = arith.constant 0 : index
      %c0_9 = arith.constant 0 : index
      %13 = vector.load %arg4[%c0_8, %c0_9] : memref<8x128xf32, #tpu.memory_space<vmem>>, vector<8x128xf32>
      %14 = vector.shape_cast %13 : vector<8x128xf32> to vector<1x8x128xf32>
      %cst_10 = arith.constant dense<0.000000e+00> : vector<1xf32>
      %15 = vector.multi_reduction <add>, %14, %cst_10 [1, 2] : vector<1x8x128xf32> to vector<1xf32>
      %16 = vector.shape_cast %15 : vector<1xf32> to vector<1x1x1xf32>
      %17 = vector.extract %16[0, 0, 0] : f32 from vector<1x1x1xf32>
      %18 = vector.broadcast %17 : f32 to vector<1x1x1xf32>
      %c0_11 = arith.constant 0 : index
      %c0_12 = arith.constant 0 : index
      %c0_13 = arith.constant 0 : index
      %19 = vector.load %arg3[%c0_11, %c0_12, %c0_13] : memref<1x1x1xf32, #tpu.memory_space<vmem>>, vector<1x1x1xf32>
      tpu.vector_store %arg3[%c0_11, %c0_12, %c0_13], %18 {strides = array<i32>} : memref<1x1x1xf32, #tpu.memory_space<vmem>>, vector<1x1x1xf32>,
    } else {
    }
    return
  }
  func.func @transform_0(%arg0: i32, %arg1: i32) -> (i32, i32) {
    %c1_i32 = arith.constant 1 : i32
    %0 = arith.muli %arg0, %c1_i32 : i32
    %1 = arith.addi %0, %arg1 : i32
    %c0_i32 = arith.constant 0 : i32
    %c0_i32_0 = arith.constant 0 : i32
    return %1, %c0_i32 : i32, i32
  }
  func.func @transform_1(%arg0: i32, %arg1: i32) -> (i32, i32, i32) {
    %c0_i32 = arith.constant 0 : i32
    %c0_i32_0 = arith.constant 0 : i32
    %c0_i32_1 = arith.constant 0 : i32
    return %arg0, %c0_i32, %c0_i32_0 : i32, i32, i32
  }
}

</mosaic_0001>

<bundles_post_ra>
// kernel: tpu_custom_call.1
= control target key start
LH: loop header
LB: loop body
LE: loop exit
PB: predicated region body
PF: predicated region fallthrough
CT: control target
= control target key end

     0   :  { %6 = vsyncpa [#allocation4], 0  ;;  %s493_s0 = inlined_call_operand.hbm [shape: f32[16,128], index: 0, kind: input, shape index: {}]   ;;  %s494_s1 = inlined_call_operand.vmem [shape: f32[2,1,1], index: 1, kind: output, shape index: {}]  }
   0x1   :  { %8 = vsyncpa [#allocation4 + $0x1], 0  ;;  %s405_s6 = smov 0   ;;  %s407_s7 = smov 0  }
   0x2   :  { %s409_s8 = smov 0   ;;  %s411_s9 = smov 0  }
   0x3   :  { %s413_s10 = smov 0   ;;  %s415_s11 = smov 0  }
   0x4 LB: > { %s244_s12 = sadd.s32 4294967295, %s393_s11   ;;  %s26_s13 = sadd.s32 1, %s389_s10  ;;  %s393_s11 = sphi %s415_s11, %s14_s11   ;;  %s389_s10 = sphi %s413_s10, %s501_s10   ;;  %s385_s9 = sphi %s411_s9, %s500_s9   ;;  %s381_s8 = sphi %s409_s8, %s499_s8   ;;  %s377_s7 = sphi %s407_s7, %s498_s7   ;;  %s373_s6 = sphi %s405_s6, %s497_s6  }
   0x5   : > { %p28_p0 = scmp.ge.s32.totalorder %s26_s13, 2  ;;  %s35_s14 = sadd.s32 1, %s381_s8 }
   0x6   : > { %p42_p1 = scmp.ne.s32.totalorder %s381_s8, %s377_s7  ;;  %p43_p2 = scmp.eq.s32.totalorder %s393_s11, 0 }
   0x7   : > { %s503_s13 = smov (%p28_p0, %s26_s13), 0  ;;  %p48_p4 = scmp.ne.s32.totalorder %s377_s7, %s373_s6 }
   0x8   : > { %p441_p3 = por %p43_p2, %p42_p1  ;;  %s32_s16 = ssub.s32 %s389_s10, %s503_s13 }
   0x9   : > { %p49_p5 = scmp.eq.s32.totalorder %s244_s12, 0  ;;  %p33_p6 = scmp.eq.s32.totalorder %s32_s16, 0 }
   0xa   : > { %p262_p8 = scmp.lt.s32.totalorder %s393_s11, 2  ;;  %s98_s19 = sand.u32 1, %s381_s8  }
   0xb   : > { %p448_p7 = por %p49_p5, %p48_p4  ;;  %s249_s20 = sshll.u32 %s389_s10, 3 }
   0xc   : > { %s454_s18 = scalar_select %p33_p6, %s381_s8, %s35_s14  }
   0xd   : > { %s248_s21 = sshll.u32 %s98_s19, 3  ;;  %s107_s24 = scalar_lea.hbm %s493_s0, %s249_s20 }
   0xe   : > { %s109_s25 = sshll.u32 %s107_s24, 4  ;;  %s102_s26 = scalar_lea.vmem [#allocation3], %s248_s21  ;;  %s110_s25 = int_to_ptr.hbm [resolvable:$true] %s109_s25 }
   0xf   : > { %s111_s27 = sshll.u32 %s102_s26, 4  ;;  %p259_p9 = pnand %p262_p8, %p441_p3  ;;  %s112_s27 = int_to_ptr.vmem [resolvable:$true] %s111_s27 }
  0x10   : > { %p250_p10 = scmp.ge.s32.totalorder %s393_s11, 1  ;;  %p116_p11 = scmp.lt.s32.totalorder %s393_s11, 3 }
  0x11   : > { %s99_s28 = scalar_lea.sflag [#allocation4], %s98_s19 }
  0x12   : > { %261 = dma.hbm_to_vmem [thread:$0]  (!%p259_p9), %s110_s25, 128, %s112_s27, %s99_s28  }
  0x13   : > { %p117_p12 = pnand %p250_p10, %p116_p11 }
  0x14   : > { %s122_s29 = sand.u32 (!%p117_p12), 1, %s377_s7  }
  0x15   : > { %120 = sbr.rel (%p117_p12) target bundleno = 217 (0xd9), region = 24  ;;  %s251_s30 = sshll.u32 (!%p117_p12), %s122_s29, 3 }
  0x16   : > { %s123_s2 = scalar_lea.sflag (!%p117_p12), [#allocation4], %s122_s29  ;;  %s126_s3 = scalar_lea.vmem (!%p117_p12), [#allocation3], %s251_s30 }
  0x1a   : > { %368 = dma.done.wait (%p448_p7), %s123_s2, 128  }
  0x1b   : > { %370 = vsyncadd (%p448_p7), %s123_s2, 4294967168  ;;  %v153_v0 = vld [vmem:[%s126_s3] sm:$0xff]  ;;  %p145_p13 = scmp.lt.s32.totalorder %s385_s9, 1  ;;  %vm174_vm0 = vcmask 0  }
  0x1c   : > { %311 = vlog2.f32 %v153_v0 }
  0x1d   : > { %s505_s9 = smov (!%p145_p13, %s385_s9), 1 }
  0x1e   : > { %s147_s6 = scalar_lea.vmem %s494_s1, %s505_s9 }
  0x22   : > { %v312_v1 = vpop.eup %311 }
  0x23   : > { %v155_v2 = vmul.f32 0.6931472, %v312_v1 }
  0x25   : > { %164 = vadd.xlane.f32.xlu0 %v155_v2 }
  0x98   : > { %v165_v3 = vpop.xlane.xlu0 %164 }
  0x99   : > { %v166_v4 = vrot.slane %v165_v3, 4 }
  0x9b   : > { %v167_v5 = vadd.f32 %v166_v4, %v165_v3 }
  0x9d   : > { %v168_v6 = vrot.slane %v167_v5, 2 }
  0x9f   : > { %v169_v7 = vadd.f32 %v168_v6, %v167_v5 }
  0xa1   : > { %v170_v8 = vrot.slane %v169_v7, 1 }
  0xa3   : > { %v171_v9 = vadd.f32 %v170_v8, %v169_v7 }
  0xa5   : > { %254 = vpush %v171_v9 }
  0xd6   : > { %s255_s12 = spop %254 }
  0xd7   : > { %v173_v10 = vstv %s255_s12 }
  0xd8   : > { %175 = vst.msk [vmem:[%s147_s6] sm:$0x1] %vm174_vm0, %v173_v10 }
  0xd9 PF: > { %s14_s11 = sadd.s32 1, %s393_s11   ;;  %s497_s6 = smov %s377_s7 }
  0xda   : > { %p11_p0 = scmp.ge.s32.totalorder %s14_s11, 4   ;;  %s498_s7 = smov %s381_s8 }
  0xdb   : > { %s499_s8 = smov %s454_s18  ;;  %s500_s9 = smov %s389_s10 }
  0xdc   : > { %s501_s10 = smov %s503_s13  ;;  %13 = sbr.rel (!%p11_p0) target bundleno = 4 (0x4), region = 72 }
  0xe1   :  { %193 = vsyncpa [#allocation4], 1 }
  0xe2   :  { %195 = vsyncpa [#allocation4 + $0x1], 1 }

</bundles_post_ra>
